<compile_context>
chip_gen: v6e
topology: v6e:2x2x1
jax: 0.10.0
libtpu: 0.0.40
codegen_flags: <defaults>
</compile_context>

<pallas_src>
import numpy as np
import jax
import jax.numpy as jnp
from jax.experimental import pallas as pl
from jax.experimental.pallas import tpu as pltpu


# ----------------------------------------------------------------------------
# Kernels
# ----------------------------------------------------------------------------
def _make_proj_kernel(num_heads, out_dim):
    """x @ w_aug -> (z, s_src, s_dst) for all heads, one row block per step."""
    H, Dout = num_heads, out_dim
    HD = H * Dout

    def kernel(x_ref, w_ref, z_ref, ssrc_ref, sdst_ref):
        zz = jnp.dot(x_ref[...], w_ref[...],
                     preferred_element_type=jnp.float32)   # [rows, HD + 2H]
        z_ref[...] = zz[:, :HD]
        ssrc_ref[...] = zz[:, HD:HD + H]
        sdst_ref[...] = zz[:, HD + H:HD + 2 * H]

    return kernel


def _make_attn_kernel(num_heads, out_dim, negative_slope=0.01,
                      apply_elu_to_output=False, agg_dtype=jnp.float32):
    """Masked softmax + aggregation for one destination-row block, all heads."""
    H, Dout = num_heads, out_dim

    def kernel(z_ref, ssrc_ref, sdst_ref, adj_ref, out_ref):
        mask = adj_ref[...] > 0                              # [dst_block, N] (int8 adj)
        neg = jnp.float32(-1e30)                             # f32-only sentinel
        sdst = sdst_ref[...]                                 # [dst_block, H]

        for h in range(H):                                   # static unroll (H small)
            # e[v, u] = leaky_relu(z_u . a_src + z_v . a_dst)
            e = sdst[:, h:h + 1] + ssrc_ref[h:h + 1, :]      # [dst_block, N]
            e = jnp.where(e > 0, e, negative_slope * e)      # leaky_relu (slope 0.01)
            e = jnp.where(mask, e, neg)

            # Masked softmax over source nodes (incoming edges of each dst v).
            m = jnp.max(e, axis=1, keepdims=True)
            p = jnp.where(mask, jnp.exp(e - m), 0.0)         # exact zeros off-graph
            denom = jnp.maximum(jnp.sum(p, axis=1, keepdims=True),
                                jnp.float32(1e-30))          # isolated-node guard
            alpha = p / denom                                # [dst_block, N]

            # h_v = sum_u alpha[v, u] * z_u   (bf16 operands only at large N)
            z_h = z_ref[:, h * Dout:(h + 1) * Dout]          # [N, Dout]
            out_h = jnp.dot(alpha.astype(agg_dtype), z_h.astype(agg_dtype),
                            preferred_element_type=jnp.float32)

            if apply_elu_to_output:
                # F.elu(alpha=1) fused into layer1's epilogue.
                out_h = jnp.where(out_h > 0, out_h,
                                  jnp.exp(jnp.minimum(out_h, 0.0)) - 1.0)

            # Direct per-head store into the concatenated output slab
            # (no jnp.concatenate relayout; results retire immediately).
            out_ref[:, h * Dout:(h + 1) * Dout] = out_h.astype(out_ref.dtype)

    return kernel


# ----------------------------------------------------------------------------
# Layer wrapper
# ----------------------------------------------------------------------------
def _pick_block(n, cap, granularity):
    """Largest block <= cap that divides n and is a multiple of granularity."""
    if n <= cap:
        return n
    b = cap
    while b >= granularity:
        if n % b == 0:
            return b
        b //= 2
    return n  # fall back to a single block


def gat_layer(x, w_heads, a_heads, adj_i8, *, apply_elu_to_output=False,
              dst_block=None, row_block=None):
    """Multi-head GAT layer (merge='cat') as projection + attention kernels.

    x:       [N, Din]  float32
    w_heads: [H, Dout, Din]   (fc.weight per head, nn.Linear layout)
    a_heads: [H, 2*Dout]      (attn_fc.weight per head; [:Dout]=a_src, [Dout:]=a_dst)
    adj_i8:  [N, N]    int8 dense adjacency, adj[dst, src]
    returns: [N, H*Dout]
    """
    H, Dout, Din = w_heads.shape
    N = x.shape[0]
    HD = H * Dout

    # Fold fc + both attention projections into ONE weight matrix (wrapper-side):
    #   cols [0:HD]       -> z_h columns      (x @ W_h^T)
    #   cols [HD:HD+H]    -> per-node src attention scores (x @ W_h^T a_src_h)
    #   cols [HD+H:HD+2H] -> per-node dst attention scores (x @ W_h^T a_dst_h)
    wT_cat = jnp.transpose(w_heads, (2, 0, 1)).reshape(Din, HD)       # [Din, HD]
    w_src = jnp.einsum("hdi,hd->ih", w_heads, a_heads[:, :Dout])      # [Din, H]
    w_dst = jnp.einsum("hdi,hd->ih", w_heads, a_heads[:, Dout:])      # [Din, H]
    w_aug = jnp.concatenate([wT_cat, w_src, w_dst], axis=1)           # [Din, HD+2H]

    # ---------------- projection kernel: runs ONCE over all N nodes ----------
    if row_block is None:
        row_block = _pick_block(N, 512, 8)
    assert N % row_block == 0
    n_row_blocks = N // row_block

    z, s_src, s_dst = pl.pallas_call(
        _make_proj_kernel(H, Dout),
        out_shape=(jax.ShapeDtypeStruct((N, HD), jnp.float32),
                   jax.ShapeDtypeStruct((N, H), jnp.float32),
                   jax.ShapeDtypeStruct((N, H), jnp.float32)),
        grid_spec=pltpu.PrefetchScalarGridSpec(
            num_scalar_prefetch=0,
            grid=(n_row_blocks,),
            in_specs=[
                pl.BlockSpec((row_block, Din), lambda i: (i, 0)),      # x rows
                pl.BlockSpec((Din, HD + 2 * H), lambda i: (0, 0)),     # folded weights
            ],
            out_specs=[
                pl.BlockSpec((row_block, HD), lambda i: (i, 0)),       # z
                pl.BlockSpec((row_block, H), lambda i: (i, 0)),        # s_src
                pl.BlockSpec((row_block, H), lambda i: (i, 0)),        # s_dst
            ],
        ),
        compiler_params=pltpu.CompilerParams(
            dimension_semantics=("parallel",)),
    )(x, w_aug)

    # Tiny [N, H] -> [H, N] transpose so per-head src scores broadcast along
    # lanes in the attention kernel (O(N*H), NOT the old O(N*Din) transpose).
    s_src_t = jnp.transpose(s_src)

    # ---------------- attention kernel: grid over destination-row blocks -----
    if dst_block is None:
        # Bigger blocks amortize per-step overhead; multiple of 32 keeps the
        # int8 adjacency block aligned to the (32,128) int8 tile.
        dst_block = _pick_block(N, 512, 32)
    assert N % dst_block == 0, "N must be divisible by dst_block"
    assert dst_block == N or dst_block % 32 == 0, \
        "partial dst blocks must be 32-aligned for int8 adjacency"
    n_blocks = N // dst_block

    # bf16 aggregation only pays off (and only matters) at large N; the toy
    # case stays bit-stable f32.  Mask/softmax path is always f32.
    agg_dtype = jnp.bfloat16 if N >= 1024 else jnp.float32

    # Adjacency is the only per-step streamed input; buffer it deeper once the
    # per-block compute has shrunk (post projection-hoist) so the DMA stays hidden.
    if n_blocks >= 3:
        adj_spec = pl.BlockSpec((dst_block, N), lambda i: (i, 0),
                                pipeline_mode=pl.Buffered(3))
    else:
        adj_spec = pl.BlockSpec((dst_block, N), lambda i: (i, 0))

    # Raise the scoped-VMEM limit only when the residents actually need it.
    resident_bytes = (
        N * HD * 4 + H * N * 4                     # z, s_src_t (grid-invariant)
        + 2 * dst_block * H * 4                    # s_dst (double buffered)
        + (3 if n_blocks >= 3 else 2) * dst_block * N * 1   # int8 adjacency buffers
        + 2 * dst_block * HD * 4                   # output (double buffered)
        + 6 * dst_block * N * 4                    # e/p/alpha/mask temporaries
    )
    cp_kwargs = {"dimension_semantics": ("parallel",)}   # dst blocks independent
    if resident_bytes > (24 << 20):
        cp_kwargs["vmem_limit_bytes"] = min(int(resident_bytes * 3 // 2), 100 << 20)

    out = pl.pallas_call(
        _make_attn_kernel(H, Dout, apply_elu_to_output=apply_elu_to_output,
                          agg_dtype=agg_dtype),
        out_shape=jax.ShapeDtypeStruct((N, HD), jnp.float32),
        grid_spec=pltpu.PrefetchScalarGridSpec(
            num_scalar_prefetch=0,
            grid=(n_blocks,),
            in_specs=[
                pl.BlockSpec((N, HD), lambda i: (0, 0)),        # z (all sources, fetched once)
                pl.BlockSpec((H, N), lambda i: (0, 0)),         # src scores, row-oriented
                pl.BlockSpec((dst_block, H), lambda i: (i, 0)), # dst scores for this block
                adj_spec,                                       # adjacency rows (int8)
            ],
            out_specs=pl.BlockSpec((dst_block, HD), lambda i: (i, 0)),
        ),
        compiler_params=pltpu.CompilerParams(**cp_kwargs),
    )(z, s_src_t, s_dst, adj_i8)
    return out


def gat_forward(h, params, adj_i8):
    """GAT.forward: layer1 (multi-head, cat) -> ELU -> layer2 (1 head).

    ELU is fused into layer1's output epilogue (applied once, not per layer2 block).
    """
    h1 = gat_layer(h, params["w1"], params["a1"], adj_i8, apply_elu_to_output=True)
    h2 = gat_layer(h1, params["w2"], params["a2"], adj_i8, apply_elu_to_output=False)
    return h2


# ----------------------------------------------------------------------------
# Pure-JAX reference for numerical validation
# ----------------------------------------------------------------------------
def gat_reference(h, params, adj_f):
    def layer(x, w_heads, a_heads):
        outs = []
        for hd in range(w_heads.shape[0]):
            w = w_heads[hd]
            a = a_heads[hd]
            dout = w.shape[0]
            z = x @ w.T
            s_src = z @ a[:dout]
            s_dst = z @ a[dout:]
            e = s_dst[:, None] + s_src[None, :]
            e = jnp.where(e > 0, e, 0.01 * e)
            masked = jnp.where(adj_f > 0, e, -1e30)
            m = jnp.max(masked, axis=1, keepdims=True)
            p = jnp.exp(masked - m) * adj_f
            alpha = p / jnp.sum(p, axis=1, keepdims=True)
            outs.append(alpha @ z)
        return jnp.concatenate(outs, axis=1)

    h1 = layer(h, params["w1"], params["a1"])
    h1 = jnp.where(h1 > 0, h1, jnp.exp(jnp.minimum(h1, 0.0)) - 1.0)
    return layer(h1, params["w2"], params["a2"])


if __name__ == "__main__":
    # Small, deterministic problem sizes.
    N = 32            # number of graph nodes
    in_dim = 16
    hidden_dim = 8
    out_dim = 4
    num_heads = 2

    key = jax.random.PRNGKey(0)
    k_feat, k_adj, k_w1, k_a1, k_w2, k_a2 = jax.random.split(key, 6)

    # Node features.
    h = jax.random.normal(k_feat, (N, in_dim), dtype=jnp.float32)

    # Deterministic synthetic graph: random sparse edges + self-loops
    # (self-loops guarantee every node has at least one incoming edge,
    #  matching standard GAT/DGL usage).  adj[dst, src].
    adj_bool = jax.random.bernoulli(k_adj, p=0.25, shape=(N, N))
    adj_bool = jnp.logical_or(adj_bool, jnp.eye(N, dtype=jnp.bool_))
    adj_i8 = adj_bool.astype(jnp.int8)       # kernel input (4x smaller than f32)
    adj_f = adj_bool.astype(jnp.float32)     # reference only

    # Parameters (deterministic init, nn.Linear weight shapes, bias=False).
    params = {
        "w1": 0.2 * jax.random.normal(k_w1, (num_heads, hidden_dim, in_dim), dtype=jnp.float32),
        "a1": 0.2 * jax.random.normal(k_a1, (num_heads, 2 * hidden_dim), dtype=jnp.float32),
        "w2": 0.2 * jax.random.normal(k_w2, (1, out_dim, hidden_dim * num_heads), dtype=jnp.float32),
        "a2": 0.2 * jax.random.normal(k_a2, (1, 2 * out_dim), dtype=jnp.float32),
    }

    out = gat_forward(h, params, adj_i8)
    out = jax.block_until_ready(out)
    assert out.shape == (N, out_dim), out.shape

    ref = jax.block_until_ready(gat_reference(h, params, adj_f))
    assert np.allclose(np.asarray(out), np.asarray(ref), rtol=1e-4, atol=1e-4), (
        "mismatch vs reference")

    print("KERNEL_OK")
</pallas_src>

<mosaic_0001>
module attributes {stable_mosaic.version = 11 : i64} {
  func.func @kernel(%arg0: i32, %arg1: memref<32x16xf32, #tpu.memory_space<vmem>>, %arg2: memref<16x20xf32, #tpu.memory_space<vmem>>, %arg3: memref<32x16xf32, #tpu.memory_space<vmem>>, %arg4: memref<32x2xf32, #tpu.memory_space<vmem>>, %arg5: memref<32x2xf32, #tpu.memory_space<vmem>>) attributes {dimension_semantics = [#tpu.dimension_semantics<parallel>], iteration_bounds = array<i64: 1>, scalar_prefetch = 0 : i64, scratch_operands = 0 : i64, tpu.core_type = #tpu.core_type<tc>, window_params = [{transform_indices = @transform_0, window_bounds = array<i64: 32, 16>}, {pipeline_mode = #tpu.pipeline_mode<synchronous>, transform_indices = @transform_1, window_bounds = array<i64: 16, 20>}, {transform_indices = @transform_2, window_bounds = array<i64: 32, 16>}, {transform_indices = @transform_3, window_bounds = array<i64: 32, 2>}, {transform_indices = @transform_4, window_bounds = array<i64: 32, 2>}]} {
    %c0 = arith.constant 0 : index
    %c0_0 = arith.constant 0 : index
    %0 = vector.load %arg1[%c0, %c0_0] : memref<32x16xf32, #tpu.memory_space<vmem>>, vector<32x16xf32>
    %c0_1 = arith.constant 0 : index
    %c0_2 = arith.constant 0 : index
    %1 = vector.load %arg2[%c0_1, %c0_2] : memref<16x20xf32, #tpu.memory_space<vmem>>, vector<16x20xf32>
    %cst = arith.constant dense<0.000000e+00> : vector<32x20xf32>
    %2 = tpu.matmul %0, %1, %cst {dimension_numbers = #tpu.dot_dimension_numbers<[1], [0], [0], [1], [0, 0, 1, 1], [], []>} : vector<32x16xf32>, vector<16x20xf32>, vector<32x20xf32> -> vector<32x20xf32>
    %3 = vector.extract_strided_slice %2 {offsets = [0, 0], sizes = [32, 16], strides = [1, 1]} : vector<32x20xf32> to vector<32x16xf32>
    %c0_3 = arith.constant 0 : index
    %c0_4 = arith.constant 0 : index
    %4 = vector.load %arg3[%c0_3, %c0_4] : memref<32x16xf32, #tpu.memory_space<vmem>>, vector<32x16xf32>
    tpu.vector_store %arg3[%c0_3, %c0_4], %3 {strides = array<i32>} : memref<32x16xf32, #tpu.memory_space<vmem>>, vector<32x16xf32>,
    %5 = vector.extract_strided_slice %2 {offsets = [0, 16], sizes = [32, 2], strides = [1, 1]} : vector<32x20xf32> to vector<32x2xf32>
    %c0_5 = arith.constant 0 : index
    %c0_6 = arith.constant 0 : index
    %6 = vector.load %arg4[%c0_5, %c0_6] : memref<32x2xf32, #tpu.memory_space<vmem>>, vector<32x2xf32>
    tpu.vector_store %arg4[%c0_5, %c0_6], %5 {strides = array<i32>} : memref<32x2xf32, #tpu.memory_space<vmem>>, vector<32x2xf32>,
    %7 = vector.extract_strided_slice %2 {offsets = [0, 18], sizes = [32, 2], strides = [1, 1]} : vector<32x20xf32> to vector<32x2xf32>
    %c0_7 = arith.constant 0 : index
    %c0_8 = arith.constant 0 : index
    %8 = vector.load %arg5[%c0_7, %c0_8] : memref<32x2xf32, #tpu.memory_space<vmem>>, vector<32x2xf32>
    tpu.vector_store %arg5[%c0_7, %c0_8], %7 {strides = array<i32>} : memref<32x2xf32, #tpu.memory_space<vmem>>, vector<32x2xf32>,
    return
  }
  func.func @transform_0(%arg0: i32) -> (i32, i32) {
    %c0_i32 = arith.constant 0 : i32
    %c0_i32_0 = arith.constant 0 : i32
    return %arg0, %c0_i32 : i32, i32
  }
  func.func @transform_1(%arg0: i32) -> (i32, i32) {
    %c0_i32 = arith.constant 0 : i32
    %c0_i32_0 = arith.constant 0 : i32
    %c0_i32_1 = arith.constant 0 : i32
    return %c0_i32, %c0_i32_0 : i32, i32
  }
  func.func @transform_2(%arg0: i32) -> (i32, i32) {
    %c0_i32 = arith.constant 0 : i32
    %c0_i32_0 = arith.constant 0 : i32
    return %arg0, %c0_i32 : i32, i32
  }
  func.func @transform_3(%arg0: i32) -> (i32, i32) {
    %c0_i32 = arith.constant 0 : i32
    %c0_i32_0 = arith.constant 0 : i32
    return %arg0, %c0_i32 : i32, i32
  }
  func.func @transform_4(%arg0: i32) -> (i32, i32) {
    %c0_i32 = arith.constant 0 : i32
    %c0_i32_0 = arith.constant 0 : i32
    return %arg0, %c0_i32 : i32, i32
  }
}

</mosaic_0001>

<bundles_post_ra>
// kernel: tpu_custom_call.1
= control target key start
LH: loop header
LB: loop body
LE: loop exit
PB: predicated region body
PF: predicated region fallthrough
CT: control target
= control target key end

     0   :  { %vm20_vm0 = vcmask 130048   ;;  %s197_s29 = smov 112   ;;  %s198_s8 = smov 110   ;;  %vm138_vm1 = vcmask 15360   ;;  %s294_s1 = inlined_call_operand.vmem [shape: f32[16,20], index: 1, kind: input, shape index: {}]   ;;  %s295_s0 = inlined_call_operand.vmem [shape: f32[32,16], index: 0, kind: input, shape index: {}]   ;;  %s296_s2 = inlined_call_operand.vmem [shape: f32[32,16], index: 2, kind: output, shape index: {0}]   ;;  %s297_s3 = inlined_call_operand.vmem [shape: f32[32,2], index: 3, kind: output, shape index: {1}]   ;;  %s298_s4 = inlined_call_operand.vmem [shape: f32[32,2], index: 4, kind: output, shape index: {2}]  }
   0x1   :  { %v19_v0 = vld [vmem:[%s294_s1 + $0x8] sm:$0xff]  ;;  %v18_v1 = vld [vmem:[%s294_s1] sm:$0xff]  ;;  %v16_v3 = vld [vmem:[%s295_s0 + $0x10] sm:$0xff] }
   0x2   :  { %181 = vmatprep.subr.mxu0 %v19_v0  ;;  %191 = vmatprep.subr.mxu1 %v19_v0  ;;  %v14_v2 = vld [vmem:[%s295_s0] sm:$0xff]  ;;  %v15_v4 = vld [vmem:[%s295_s0 + $0x8] sm:$0xff]  ;;  %v17_v5 = vld [vmem:[%s295_s0 + $0x18] sm:$0xff] }
   0x3   :  { %182 = vmatpush3.msra.mxu0 %v19_v0  ;;  %193 = vmatpush3.msra.mxu1 %v19_v0 }
   0x4   :  { %183 = vmatprep.subr.mxu0 %v18_v1  ;;  %192 = vmatprep.subr.mxu1 %v18_v1 }
   0x5   :  { %184 = vmatpush3.msra.mxu0 %v18_v1  ;;  %194 = vmatpush3.msra.mxu1 %v18_v1 }
   0x6   :  { %185 = vmatprep.mubr.msk.f32.mxu0 %vm20_vm0, %v14_v2  ;;  %188 = vmatprep.mubr.msk.f32.mxu1 %vm20_vm0, %v16_v3 }
   0x7   :  { %186 = vmatmul.mubr.msk.f32.vlgmr.msra.gmra.mxu0 %vm20_vm0, %v15_v4  ;;  %189 = vmatmul.mubr.msk.f32.vlgmr.msra.gmra.mxu1 %vm20_vm0, %v17_v5 }
  0xc7   :  { %v187_v6 = vpop.f32.mrf.mxu0  ;;  %v190_v7 = vpop.f32.mrf.mxu1 }
  0xc8   :  { %119 = vst.msk [vmem:[%s296_s2 + $0x8] sm:$0xff] %vm20_vm0, %v187_v6  ;;  %121 = vst.msk [vmem:[%s296_s2 + $0x18] sm:$0xff] %vm20_vm0, %v190_v7  ;;  %132 = vrot.lane.b32.xlu1 %v190_v7, %s197_s29  ;;  %128 = vrot.lane.b32.xlu0 %v187_v6, %s197_s29 }
  0xc9   :  { %v99_v8 = vpop.f32.mrf.mxu0  ;;  %v109_v9 = vpop.f32.mrf.mxu1 }
  0xca   :  { %118 = vst.msk [vmem:[%s296_s2] sm:$0xff] %vm20_vm0, %v99_v8  ;;  %120 = vst.msk [vmem:[%s296_s2 + $0x10] sm:$0xff] %vm20_vm0, %v109_v9 }
  0xcc   :  { %145 = vrot.lane.b32.xlu1 %v187_v6, %s198_s8  ;;  %126 = vrot.lane.b32.xlu0 %v99_v8, %s197_s29 }
  0xd0   :  { %130 = vrot.lane.b32.xlu1 %v109_v9, %s197_s29  ;;  %143 = vrot.lane.b32.xlu0 %v99_v8, %s198_s8 }
  0xd4   :  { %149 = vrot.lane.b32.xlu1 %v190_v7, %s198_s8  ;;  %147 = vrot.lane.b32.xlu0 %v109_v9, %s198_s8 }
 0x13a   :  { %v133_v10 = vpop.permute.xlu1 %132  ;;  %v129_v11 = vpop.permute.xlu0 %128 }
 0x13b   :  { %142 = vst.msk [vmem:[%s297_s3 + $0x18] sm:$0xff] %vm138_vm1, %v133_v10  ;;  %140 = vst.msk [vmem:[%s297_s3 + $0x8] sm:$0xff] %vm138_vm1, %v129_v11 }
 0x13e   :  { %v146_v12 = vpop.permute.xlu1 %145  ;;  %v127_v13 = vpop.permute.xlu0 %126 }
 0x13f   :  { %156 = vst.msk [vmem:[%s298_s4 + $0x8] sm:$0xff] %vm138_vm1, %v146_v12  ;;  %139 = vst.msk [vmem:[%s297_s3] sm:$0xff] %vm138_vm1, %v127_v13 }
 0x142   :  { %v131_v14 = vpop.permute.xlu1 %130  ;;  %v144_v15 = vpop.permute.xlu0 %143 }
 0x143   :  { %141 = vst.msk [vmem:[%s297_s3 + $0x10] sm:$0xff] %vm138_vm1, %v131_v14  ;;  %155 = vst.msk [vmem:[%s298_s4] sm:$0xff] %vm138_vm1, %v144_v15 }
 0x146   :  { %v150_v16 = vpop.permute.xlu1 %149  ;;  %v148_v17 = vpop.permute.xlu0 %147 }
 0x147   :  { %158 = vst.msk [vmem:[%s298_s4 + $0x18] sm:$0xff] %vm138_vm1, %v150_v16  ;;  %157 = vst.msk [vmem:[%s298_s4 + $0x10] sm:$0xff] %vm138_vm1, %v148_v17 }

</bundles_post_ra>
